<compile_context>
chip_gen: v7x
topology: tpu7x:2x2x1
jax: 0.10.0
libtpu: 0.0.40
codegen_flags: <defaults>
</compile_context>

<pallas_src>
import functools

import jax
import jax.numpy as jnp
from jax.experimental import pallas as pl
from jax.experimental.pallas import tpu as pltpu


def _block_kernel(*refs, H, W, has_sc_conv):
    """Fused Block forward for one batch element, stride == 1.

    Ref layout (inputs..., output):
      mask_ref: (9, HW)            per-tap spatial-border validity masks (0/1)
      x_ref:    (1, C_in, HW)      input, channels-major, flattened spatial (lane-dense)
      w1_ref:   (planes, C_in)     1x1 expand conv, bn1 scale folded in
      b1_ref:   (planes, 1)        bn1 bias
      w2_ref:   (planes, 9)        3x3 depthwise taps (kh*3 + kw), bn2 scale folded in
      b2_ref:   (planes, 1)        bn2 bias
      w3_ref:   (out_planes, planes) 1x1 project conv, bn3 scale folded in
      b3_ref:   (out_planes, 1)    bn3 bias
      [ws_ref:  (out_planes, C_in) shortcut 1x1 conv, bn_sc scale folded in
       bs_ref:  (out_planes, 1)    bn_sc bias]            (only when has_sc_conv)
      o_ref:    (1, out_planes, HW)
    """
    if has_sc_conv:
        (mask_ref, x_ref, w1_ref, b1_ref, w2_ref, b2_ref,
         w3_ref, b3_ref, ws_ref, bs_ref, o_ref) = refs
    else:
        (mask_ref, x_ref, w1_ref, b1_ref, w2_ref, b2_ref,
         w3_ref, b3_ref, o_ref) = refs

    HW = H * W
    x = x_ref[0]                                                 # (C_in, HW)

    # ---- conv1 (1x1 expand) + bn1 (scale folded) + relu1  -> MXU -----------------
    h = jnp.dot(w1_ref[...], x, preferred_element_type=jnp.float32)   # (planes, HW)
    h = jnp.maximum(h + b1_ref[...], 0.0)

    # ---- conv2 (3x3 depthwise, stride 1, pad 1) + bn2 (folded) + relu2 -----------
    # out[p, t] = sum_{dh,dw} w2[p, tap] * h[p, t + dh*W + dw]  (zero-padded borders)
    # Each tap: XLU roll of h along the flattened spatial axis + (1, HW) border mask
    # + per-channel tap weight, accumulated with VPU FMAs.  Wrap-around positions
    # introduced by the roll are exactly the border-invalid ones -> killed by mask.
    w2 = w2_ref[...]                                             # (planes, 9)
    acc = w2[:, 4:5] * h                                         # center tap, always valid
    tap = 0
    for dh in (-1, 0, 1):
        for dw in (-1, 0, 1):
            if dh == 0 and dw == 0:
                tap += 1
                continue
            d = dh * W + dw
            shifted = pltpu.roll(h, shift=(-d) % HW, axis=1)     # shifted[t] = h[t + d]
            acc = acc + w2[:, tap:tap + 1] * (mask_ref[tap:tap + 1, :] * shifted)
            tap += 1
    h = jnp.maximum(acc + b2_ref[...], 0.0)                      # (planes, HW)

    # ---- conv3 (1x1 project) + bn3 (scale folded), no relu  -> MXU ---------------
    h = h.astype(w3_ref.dtype)
    out = jnp.dot(w3_ref[...], h, preferred_element_type=jnp.float32) + b3_ref[...]

    # ---- shortcut (stride == 1) --------------------------------------------------
    if has_sc_conv:
        sc = jnp.dot(ws_ref[...], x, preferred_element_type=jnp.float32) + bs_ref[...]
    else:
        sc = x.astype(jnp.float32)                               # identity shortcut

    o_ref[0] = (out + sc).astype(o_ref.dtype)


def _bn_fold(bn, eps=1e-5):
    """Inference-mode BatchNorm -> (per-channel scale (C,), bias (C, 1))."""
    gamma, beta, mean, var = bn
    scale = (gamma / jnp.sqrt(var + eps)).astype(jnp.float32)
    bias = (beta - mean * scale).reshape(-1, 1).astype(jnp.float32)
    return scale, bias


def block_forward(x, params, *, stride=1):
    """JAX/Pallas equivalent of Block.forward (stride == 1, inference BN)."""
    if stride != 1:
        # TODO(synk): strided depthwise path not implemented in the fused kernel.
        raise NotImplementedError("Pallas Block kernel currently supports stride == 1.")

    N, C_in, H, W = x.shape
    HW = H * W
    dt = x.dtype
    planes = params["conv1"].shape[0]
    out_planes = params["conv3"].shape[0]

    # Fold BN scales into the conv weights; only biases remain in-kernel.
    s1, b1 = _bn_fold(params["bn1"])
    s2, b2 = _bn_fold(params["bn2"])
    s3, b3 = _bn_fold(params["bn3"])
    w1 = (s1[:, None] * params["conv1"].astype(jnp.float32)).astype(dt)           # (planes, C_in)
    w2 = (s2[:, None] * params["conv2"].reshape(planes, 9).astype(jnp.float32))   # (planes, 9) f32
    w3 = (s3[:, None] * params["conv3"].astype(jnp.float32)).astype(dt)           # (out_planes, planes)

    has_sc_conv = "conv_sc" in params
    if has_sc_conv:
        ss, bs = _bn_fold(params["bn_sc"])
        ws = (ss[:, None] * params["conv_sc"].astype(jnp.float32)).astype(dt)     # (out_planes, C_in)
    else:
        assert C_in == out_planes, "identity shortcut requires in_planes == out_planes"

    # Border-validity masks for the 9 depthwise taps, built once (hoisted off the
    # per-sample grid loop).  mask[tap, t] = 1 iff the tap's source pixel is in-bounds.
    oh = jnp.arange(HW, dtype=jnp.int32) // W
    ow = jnp.arange(HW, dtype=jnp.int32) % W
    masks = []
    for dh in (-1, 0, 1):
        for dw in (-1, 0, 1):
            m = ((oh + dh >= 0) & (oh + dh < H) & (ow + dw >= 0) & (ow + dw < W))
            masks.append(m.astype(jnp.float32))
    masks = jnp.stack(masks, axis=0)                                              # (9, HW)

    full = lambda n: (0, 0)   # weights/masks: whole-array block, resident across grid

    in_specs = [
        pl.BlockSpec((9, HW), full),                          # tap border masks
        pl.BlockSpec((1, C_in, HW), lambda n: (n, 0, 0)),     # x (lane-dense HW)
        pl.BlockSpec((planes, C_in), full),                   # w1 (bn1-folded)
        pl.BlockSpec((planes, 1), full),                      # b1
        pl.BlockSpec((planes, 9), full),                      # w2 (bn2-folded taps)
        pl.BlockSpec((planes, 1), full),                      # b2
        pl.BlockSpec((out_planes, planes), full),             # w3 (bn3-folded)
        pl.BlockSpec((out_planes, 1), full),                  # b3
    ]
    args = [masks, x.reshape(N, C_in, HW), w1, b1, w2, b2, w3, b3]
    if has_sc_conv:
        in_specs += [pl.BlockSpec((out_planes, C_in), full),  # shortcut conv (bn-folded)
                     pl.BlockSpec((out_planes, 1), full)]     # shortcut bias
        args += [ws, bs]

    kernel = functools.partial(_block_kernel, H=H, W=W, has_sc_conv=has_sc_conv)

    out = pl.pallas_call(
        kernel,
        out_shape=jax.ShapeDtypeStruct((N, out_planes, HW), dt),
        grid=(N,),
        in_specs=in_specs,
        out_specs=pl.BlockSpec((1, out_planes, HW), lambda n: (n, 0, 0)),
        compiler_params=pltpu.CompilerParams(
            dimension_semantics=("parallel",),       # shard batch across TCs (v7x)
            vmem_limit_bytes=32 * 1024 * 1024,
        ),
    )(*args)

    return out.reshape(N, out_planes, H, W)


# ----------------------------- pure-JAX reference -----------------------------

def _conv1x1_ref(x, w):
    return jax.lax.conv_general_dilated(
        x, w[:, :, None, None], window_strides=(1, 1), padding="VALID",
        dimension_numbers=("NCHW", "OIHW", "NCHW"))


def _bn_ref(x, gamma, beta, mean, var, eps=1e-5):
    s = gamma / jnp.sqrt(var + eps)
    return x * s[None, :, None, None] + (beta - mean * s)[None, :, None, None]


def block_forward_ref(x, params, *, stride=1):
    w2 = params["conv2"]
    planes = w2.shape[0]
    h = jax.nn.relu(_bn_ref(_conv1x1_ref(x, params["conv1"]), *params["bn1"]))
    h = jax.lax.conv_general_dilated(
        h, w2[:, None, :, :], window_strides=(stride, stride),
        padding=((1, 1), (1, 1)),
        dimension_numbers=("NCHW", "OIHW", "NCHW"),
        feature_group_count=planes)
    h = jax.nn.relu(_bn_ref(h, *params["bn2"]))
    out = _bn_ref(_conv1x1_ref(h, params["conv3"]), *params["bn3"])
    if stride == 1:
        if "conv_sc" in params:
            sc = _bn_ref(_conv1x1_ref(x, params["conv_sc"]), *params["bn_sc"])
        else:
            sc = x
        out = out + sc
    return out


if __name__ == "__main__":
    key = jax.random.PRNGKey(0)
    N, in_planes, H, W = 2, 4, 16, 16
    expansion, out_planes, stride = 2, 8, 1
    planes = expansion * in_planes

    ks = jax.random.split(key, 10)

    def rnd(k, shape, scale=0.3):
        return scale * jax.random.normal(k, shape, dtype=jnp.float32)

    def make_bn(k, c):
        k1, k2, k3, k4 = jax.random.split(k, 4)
        gamma = 1.0 + 0.1 * jax.random.normal(k1, (c,), dtype=jnp.float32)
        beta = 0.1 * jax.random.normal(k2, (c,), dtype=jnp.float32)
        mean = 0.1 * jax.random.normal(k3, (c,), dtype=jnp.float32)
        var = 1.0 + 0.1 * jax.random.uniform(k4, (c,), dtype=jnp.float32)
        return (gamma, beta, mean, var)

    x = jax.random.normal(ks[0], (N, in_planes, H, W), dtype=jnp.float32)
    params = {
        "conv1": rnd(ks[1], (planes, in_planes)),
        "bn1": make_bn(ks[2], planes),
        "conv2": rnd(ks[3], (planes, 3, 3)),
        "bn2": make_bn(ks[4], planes),
        "conv3": rnd(ks[5], (out_planes, planes)),
        "bn3": make_bn(ks[6], out_planes),
    }
    if stride == 1 and in_planes != out_planes:
        params["conv_sc"] = rnd(ks[7], (out_planes, in_planes))
        params["bn_sc"] = make_bn(ks[8], out_planes)

    fwd = jax.jit(functools.partial(block_forward, stride=stride))
    out = fwd(x, params)
    jax.block_until_ready(out)

    ref = block_forward_ref(x, params, stride=stride)
    assert out.shape == (N, out_planes, H, W), out.shape
    max_err = float(jnp.max(jnp.abs(out - ref)))
    assert jnp.allclose(out, ref, atol=2e-2, rtol=2e-2), f"max abs err {max_err}"

    print("KERNEL_OK")
</pallas_src>

<mosaic_0001>
module attributes {stable_mosaic.version = 11 : i64} {
  func.func @_block_kernel(%arg0: i32, %arg1: memref<9x256xf32, #tpu.memory_space<vmem>>, %arg2: memref<1x4x256xf32, #tpu.memory_space<vmem>>, %arg3: memref<8x4xf32, #tpu.memory_space<vmem>>, %arg4: memref<8x1xf32, #tpu.memory_space<vmem>>, %arg5: memref<8x9xf32, #tpu.memory_space<vmem>>, %arg6: memref<8x1xf32, #tpu.memory_space<vmem>>, %arg7: memref<8x8xf32, #tpu.memory_space<vmem>>, %arg8: memref<8x1xf32, #tpu.memory_space<vmem>>, %arg9: memref<8x4xf32, #tpu.memory_space<vmem>>, %arg10: memref<8x1xf32, #tpu.memory_space<vmem>>, %arg11: memref<1x8x256xf32, #tpu.memory_space<vmem>>) attributes {dimension_semantics = [#tpu.dimension_semantics<parallel>], iteration_bounds = array<i64: 2>, scalar_prefetch = 0 : i64, scratch_operands = 0 : i64, tpu.core_type = #tpu.core_type<tc>, window_params = [{pipeline_mode = #tpu.pipeline_mode<synchronous>, transform_indices = @transform_0, window_bounds = array<i64: 9, 256>}, {transform_indices = @transform_1, window_bounds = array<i64: 1, 4, 256>}, {pipeline_mode = #tpu.pipeline_mode<synchronous>, transform_indices = @transform_2, window_bounds = array<i64: 8, 4>}, {pipeline_mode = #tpu.pipeline_mode<synchronous>, transform_indices = @transform_3, window_bounds = array<i64: 8, 1>}, {pipeline_mode = #tpu.pipeline_mode<synchronous>, transform_indices = @transform_4, window_bounds = array<i64: 8, 9>}, {pipeline_mode = #tpu.pipeline_mode<synchronous>, transform_indices = @transform_5, window_bounds = array<i64: 8, 1>}, {pipeline_mode = #tpu.pipeline_mode<synchronous>, transform_indices = @transform_6, window_bounds = array<i64: 8, 8>}, {pipeline_mode = #tpu.pipeline_mode<synchronous>, transform_indices = @transform_7, window_bounds = array<i64: 8, 1>}, {pipeline_mode = #tpu.pipeline_mode<synchronous>, transform_indices = @transform_8, window_bounds = array<i64: 8, 4>}, {pipeline_mode = #tpu.pipeline_mode<synchronous>, transform_indices = @transform_9, window_bounds = array<i64: 8, 1>}, {transform_indices = @transform_10, window_bounds = array<i64: 1, 8, 256>}]} {
    %c0 = arith.constant 0 : index
    %c0_0 = arith.constant 0 : index
    %c0_1 = arith.constant 0 : index
    %0 = vector.load %arg2[%c0, %c0_0, %c0_1] : memref<1x4x256xf32, #tpu.memory_space<vmem>>, vector<1x4x256xf32>
    %1 = vector.shape_cast %0 : vector<1x4x256xf32> to vector<4x256xf32>
    %c0_2 = arith.constant 0 : index
    %c0_3 = arith.constant 0 : index
    %2 = vector.load %arg3[%c0_2, %c0_3] : memref<8x4xf32, #tpu.memory_space<vmem>>, vector<8x4xf32>
    %cst = arith.constant dense<0.000000e+00> : vector<8x256xf32>
    %3 = tpu.matmul %2, %1, %cst {dimension_numbers = #tpu.dot_dimension_numbers<[1], [0], [0], [1], [0, 0, 1, 1], [], []>} : vector<8x4xf32>, vector<4x256xf32>, vector<8x256xf32> -> vector<8x256xf32>
    %c0_4 = arith.constant 0 : index
    %c0_5 = arith.constant 0 : index
    %4 = vector.load %arg4[%c0_4, %c0_5] : memref<8x1xf32, #tpu.memory_space<vmem>>, vector<8x1xf32>
    %5 = vector.broadcast %4 : vector<8x1xf32> to vector<8x256xf32>
    %6 = arith.addf %3, %5 : vector<8x256xf32>
    %cst_6 = arith.constant 0.000000e+00 : f32
    %7 = vector.broadcast %cst_6 : f32 to vector<8x256xf32>
    %8 = arith.maximumf %6, %7 : vector<8x256xf32>
    %c0_7 = arith.constant 0 : index
    %c0_8 = arith.constant 0 : index
    %9 = vector.load %arg5[%c0_7, %c0_8] : memref<8x9xf32, #tpu.memory_space<vmem>>, vector<8x9xf32>
    %10 = vector.extract_strided_slice %9 {offsets = [0, 4], sizes = [8, 1], strides = [1, 1]} : vector<8x9xf32> to vector<8x1xf32>
    %11 = vector.broadcast %10 : vector<8x1xf32> to vector<8x256xf32>
    %12 = arith.mulf %11, %8 : vector<8x256xf32>
    %c17_i32 = arith.constant 17 : i32
    %13 = tpu.dynamic_rotate %8 by %c17_i32 dim 1 : vector<8x256xf32>, i32 -> vector<8x256xf32>
    %14 = vector.extract_strided_slice %9 {offsets = [0, 0], sizes = [8, 1], strides = [1, 1]} : vector<8x9xf32> to vector<8x1xf32>
    %c0_9 = arith.constant 0 : index
    %c0_10 = arith.constant 0 : index
    %15 = vector.load %arg1[%c0_9, %c0_10] : memref<9x256xf32, #tpu.memory_space<vmem>>, vector<1x256xf32>
    %16 = vector.broadcast %15 : vector<1x256xf32> to vector<8x256xf32>
    %17 = arith.mulf %16, %13 : vector<8x256xf32>
    %18 = vector.broadcast %14 : vector<8x1xf32> to vector<8x256xf32>
    %19 = arith.mulf %18, %17 : vector<8x256xf32>
    %20 = arith.addf %12, %19 : vector<8x256xf32>
    %c16_i32 = arith.constant 16 : i32
    %21 = tpu.dynamic_rotate %8 by %c16_i32 dim 1 : vector<8x256xf32>, i32 -> vector<8x256xf32>
    %22 = vector.extract_strided_slice %9 {offsets = [0, 1], sizes = [8, 1], strides = [1, 1]} : vector<8x9xf32> to vector<8x1xf32>
    %c1 = arith.constant 1 : index
    %c0_11 = arith.constant 0 : index
    %23 = vector.load %arg1[%c1, %c0_11] : memref<9x256xf32, #tpu.memory_space<vmem>>, vector<1x256xf32>
    %24 = vector.broadcast %23 : vector<1x256xf32> to vector<8x256xf32>
    %25 = arith.mulf %24, %21 : vector<8x256xf32>
    %26 = vector.broadcast %22 : vector<8x1xf32> to vector<8x256xf32>
    %27 = arith.mulf %26, %25 : vector<8x256xf32>
    %28 = arith.addf %20, %27 : vector<8x256xf32>
    %c15_i32 = arith.constant 15 : i32
    %29 = tpu.dynamic_rotate %8 by %c15_i32 dim 1 : vector<8x256xf32>, i32 -> vector<8x256xf32>
    %30 = vector.extract_strided_slice %9 {offsets = [0, 2], sizes = [8, 1], strides = [1, 1]} : vector<8x9xf32> to vector<8x1xf32>
    %c2 = arith.constant 2 : index
    %c0_12 = arith.constant 0 : index
    %31 = vector.load %arg1[%c2, %c0_12] : memref<9x256xf32, #tpu.memory_space<vmem>>, vector<1x256xf32>
    %32 = vector.broadcast %31 : vector<1x256xf32> to vector<8x256xf32>
    %33 = arith.mulf %32, %29 : vector<8x256xf32>
    %34 = vector.broadcast %30 : vector<8x1xf32> to vector<8x256xf32>
    %35 = arith.mulf %34, %33 : vector<8x256xf32>
    %36 = arith.addf %28, %35 : vector<8x256xf32>
    %c1_i32 = arith.constant 1 : i32
    %37 = tpu.dynamic_rotate %8 by %c1_i32 dim 1 : vector<8x256xf32>, i32 -> vector<8x256xf32>
    %38 = vector.extract_strided_slice %9 {offsets = [0, 3], sizes = [8, 1], strides = [1, 1]} : vector<8x9xf32> to vector<8x1xf32>
    %c3 = arith.constant 3 : index
    %c0_13 = arith.constant 0 : index
    %39 = vector.load %arg1[%c3, %c0_13] : memref<9x256xf32, #tpu.memory_space<vmem>>, vector<1x256xf32>
    %40 = vector.broadcast %39 : vector<1x256xf32> to vector<8x256xf32>
    %41 = arith.mulf %40, %37 : vector<8x256xf32>
    %42 = vector.broadcast %38 : vector<8x1xf32> to vector<8x256xf32>
    %43 = arith.mulf %42, %41 : vector<8x256xf32>
    %44 = arith.addf %36, %43 : vector<8x256xf32>
    %c255_i32 = arith.constant 255 : i32
    %45 = tpu.dynamic_rotate %8 by %c255_i32 dim 1 : vector<8x256xf32>, i32 -> vector<8x256xf32>
    %46 = vector.extract_strided_slice %9 {offsets = [0, 5], sizes = [8, 1], strides = [1, 1]} : vector<8x9xf32> to vector<8x1xf32>
    %c5 = arith.constant 5 : index
    %c0_14 = arith.constant 0 : index
    %47 = vector.load %arg1[%c5, %c0_14] : memref<9x256xf32, #tpu.memory_space<vmem>>, vector<1x256xf32>
    %48 = vector.broadcast %47 : vector<1x256xf32> to vector<8x256xf32>
    %49 = arith.mulf %48, %45 : vector<8x256xf32>
    %50 = vector.broadcast %46 : vector<8x1xf32> to vector<8x256xf32>
    %51 = arith.mulf %50, %49 : vector<8x256xf32>
    %52 = arith.addf %44, %51 : vector<8x256xf32>
    %c241_i32 = arith.constant 241 : i32
    %53 = tpu.dynamic_rotate %8 by %c241_i32 dim 1 : vector<8x256xf32>, i32 -> vector<8x256xf32>
    %54 = vector.extract_strided_slice %9 {offsets = [0, 6], sizes = [8, 1], strides = [1, 1]} : vector<8x9xf32> to vector<8x1xf32>
    %c6 = arith.constant 6 : index
    %c0_15 = arith.constant 0 : index
    %55 = vector.load %arg1[%c6, %c0_15] : memref<9x256xf32, #tpu.memory_space<vmem>>, vector<1x256xf32>
    %56 = vector.broadcast %55 : vector<1x256xf32> to vector<8x256xf32>
    %57 = arith.mulf %56, %53 : vector<8x256xf32>
    %58 = vector.broadcast %54 : vector<8x1xf32> to vector<8x256xf32>
    %59 = arith.mulf %58, %57 : vector<8x256xf32>
    %60 = arith.addf %52, %59 : vector<8x256xf32>
    %c240_i32 = arith.constant 240 : i32
    %61 = tpu.dynamic_rotate %8 by %c240_i32 dim 1 : vector<8x256xf32>, i32 -> vector<8x256xf32>
    %62 = vector.extract_strided_slice %9 {offsets = [0, 7], sizes = [8, 1], strides = [1, 1]} : vector<8x9xf32> to vector<8x1xf32>
    %c7 = arith.constant 7 : index
    %c0_16 = arith.constant 0 : index
    %63 = vector.load %arg1[%c7, %c0_16] : memref<9x256xf32, #tpu.memory_space<vmem>>, vector<1x256xf32>
    %64 = vector.broadcast %63 : vector<1x256xf32> to vector<8x256xf32>
    %65 = arith.mulf %64, %61 : vector<8x256xf32>
    %66 = vector.broadcast %62 : vector<8x1xf32> to vector<8x256xf32>
    %67 = arith.mulf %66, %65 : vector<8x256xf32>
    %68 = arith.addf %60, %67 : vector<8x256xf32>
    %c239_i32 = arith.constant 239 : i32
    %69 = tpu.dynamic_rotate %8 by %c239_i32 dim 1 : vector<8x256xf32>, i32 -> vector<8x256xf32>
    %70 = vector.extract_strided_slice %9 {offsets = [0, 8], sizes = [8, 1], strides = [1, 1]} : vector<8x9xf32> to vector<8x1xf32>
    %c8 = arith.constant 8 : index
    %c0_17 = arith.constant 0 : index
    %71 = vector.load %arg1[%c8, %c0_17] : memref<9x256xf32, #tpu.memory_space<vmem>>, vector<1x256xf32>
    %72 = vector.broadcast %71 : vector<1x256xf32> to vector<8x256xf32>
    %73 = arith.mulf %72, %69 : vector<8x256xf32>
    %74 = vector.broadcast %70 : vector<8x1xf32> to vector<8x256xf32>
    %75 = arith.mulf %74, %73 : vector<8x256xf32>
    %76 = arith.addf %68, %75 : vector<8x256xf32>
    %c0_18 = arith.constant 0 : index
    %c0_19 = arith.constant 0 : index
    %77 = vector.load %arg6[%c0_18, %c0_19] : memref<8x1xf32, #tpu.memory_space<vmem>>, vector<8x1xf32>
    %78 = vector.broadcast %77 : vector<8x1xf32> to vector<8x256xf32>
    %79 = arith.addf %76, %78 : vector<8x256xf32>
    %cst_20 = arith.constant 0.000000e+00 : f32
    %80 = vector.broadcast %cst_20 : f32 to vector<8x256xf32>
    %81 = arith.maximumf %79, %80 : vector<8x256xf32>
    %c0_21 = arith.constant 0 : index
    %c0_22 = arith.constant 0 : index
    %82 = vector.load %arg7[%c0_21, %c0_22] : memref<8x8xf32, #tpu.memory_space<vmem>>, vector<8x8xf32>
    %cst_23 = arith.constant dense<0.000000e+00> : vector<8x256xf32>
    %83 = tpu.matmul %82, %81, %cst_23 {dimension_numbers = #tpu.dot_dimension_numbers<[1], [0], [0], [1], [0, 0, 1, 1], [], []>} : vector<8x8xf32>, vector<8x256xf32>, vector<8x256xf32> -> vector<8x256xf32>
    %c0_24 = arith.constant 0 : index
    %c0_25 = arith.constant 0 : index
    %84 = vector.load %arg8[%c0_24, %c0_25] : memref<8x1xf32, #tpu.memory_space<vmem>>, vector<8x1xf32>
    %85 = vector.broadcast %84 : vector<8x1xf32> to vector<8x256xf32>
    %86 = arith.addf %83, %85 : vector<8x256xf32>
    %c0_26 = arith.constant 0 : index
    %c0_27 = arith.constant 0 : index
    %87 = vector.load %arg9[%c0_26, %c0_27] : memref<8x4xf32, #tpu.memory_space<vmem>>, vector<8x4xf32>
    %cst_28 = arith.constant dense<0.000000e+00> : vector<8x256xf32>
    %88 = tpu.matmul %87, %1, %cst_28 {dimension_numbers = #tpu.dot_dimension_numbers<[1], [0], [0], [1], [0, 0, 1, 1], [], []>} : vector<8x4xf32>, vector<4x256xf32>, vector<8x256xf32> -> vector<8x256xf32>
    %c0_29 = arith.constant 0 : index
    %c0_30 = arith.constant 0 : index
    %89 = vector.load %arg10[%c0_29, %c0_30] : memref<8x1xf32, #tpu.memory_space<vmem>>, vector<8x1xf32>
    %90 = vector.broadcast %89 : vector<8x1xf32> to vector<8x256xf32>
    %91 = arith.addf %88, %90 : vector<8x256xf32>
    %92 = arith.addf %86, %91 : vector<8x256xf32>
    %c0_31 = arith.constant 0 : index
    %c0_32 = arith.constant 0 : index
    %c0_33 = arith.constant 0 : index
    %93 = vector.load %arg11[%c0_31, %c0_32, %c0_33] : memref<1x8x256xf32, #tpu.memory_space<vmem>>, vector<1x8x256xf32>
    %94 = vector.shape_cast %93 : vector<1x8x256xf32> to vector<8x256xf32>
    %95 = vector.shape_cast %92 : vector<8x256xf32> to vector<1x8x256xf32>
    tpu.vector_store %arg11[%c0_31, %c0_32, %c0_33], %95 {strides = array<i32>} : memref<1x8x256xf32, #tpu.memory_space<vmem>>, vector<1x8x256xf32>,
    return
  }
  func.func @transform_0(%arg0: i32) -> (i32, i32) {
    %c0_i32 = arith.constant 0 : i32
    %c0_i32_0 = arith.constant 0 : i32
    %c0_i32_1 = arith.constant 0 : i32
    return %c0_i32, %c0_i32_0 : i32, i32
  }
  func.func @transform_1(%arg0: i32) -> (i32, i32, i32) {
    %c0_i32 = arith.constant 0 : i32
    %c0_i32_0 = arith.constant 0 : i32
    %c0_i32_1 = arith.constant 0 : i32
    return %arg0, %c0_i32, %c0_i32_0 : i32, i32, i32
  }
  func.func @transform_2(%arg0: i32) -> (i32, i32) {
    %c0_i32 = arith.constant 0 : i32
    %c0_i32_0 = arith.constant 0 : i32
    %c0_i32_1 = arith.constant 0 : i32
    return %c0_i32, %c0_i32_0 : i32, i32
  }
  func.func @transform_3(%arg0: i32) -> (i32, i32) {
    %c0_i32 = arith.constant 0 : i32
    %c0_i32_0 = arith.constant 0 : i32
    %c0_i32_1 = arith.constant 0 : i32
    return %c0_i32, %c0_i32_0 : i32, i32
  }
  func.func @transform_4(%arg0: i32) -> (i32, i32) {
    %c0_i32 = arith.constant 0 : i32
    %c0_i32_0 = arith.constant 0 : i32
    %c0_i32_1 = arith.constant 0 : i32
    return %c0_i32, %c0_i32_0 : i32, i32
  }
  func.func @transform_5(%arg0: i32) -> (i32, i32) {
    %c0_i32 = arith.constant 0 : i32
    %c0_i32_0 = arith.constant 0 : i32
    %c0_i32_1 = arith.constant 0 : i32
    return %c0_i32, %c0_i32_0 : i32, i32
  }
  func.func @transform_6(%arg0: i32) -> (i32, i32) {
    %c0_i32 = arith.constant 0 : i32
    %c0_i32_0 = arith.constant 0 : i32
    %c0_i32_1 = arith.constant 0 : i32
    return %c0_i32, %c0_i32_0 : i32, i32
  }
  func.func @transform_7(%arg0: i32) -> (i32, i32) {
    %c0_i32 = arith.constant 0 : i32
    %c0_i32_0 = arith.constant 0 : i32
    %c0_i32_1 = arith.constant 0 : i32
    return %c0_i32, %c0_i32_0 : i32, i32
  }
  func.func @transform_8(%arg0: i32) -> (i32, i32) {
    %c0_i32 = arith.constant 0 : i32
    %c0_i32_0 = arith.constant 0 : i32
    %c0_i32_1 = arith.constant 0 : i32
    return %c0_i32, %c0_i32_0 : i32, i32
  }
  func.func @transform_9(%arg0: i32) -> (i32, i32) {
    %c0_i32 = arith.constant 0 : i32
    %c0_i32_0 = arith.constant 0 : i32
    %c0_i32_1 = arith.constant 0 : i32
    return %c0_i32, %c0_i32_0 : i32, i32
  }
  func.func @transform_10(%arg0: i32) -> (i32, i32, i32) {
    %c0_i32 = arith.constant 0 : i32
    %c0_i32_0 = arith.constant 0 : i32
    %c0_i32_1 = arith.constant 0 : i32
    return %arg0, %c0_i32, %c0_i32_0 : i32, i32, i32
  }
}

</mosaic_0001>

<bundles_post_ra>
// kernel: block_forward.1
= control target key start
LH: loop header
LB: loop body
LE: loop exit
PB: predicated region body
PF: predicated region fallthrough
CT: control target
= control target key end

     0   :  { %s1086_s13 = smov 0   ;;  %s1274_s0 = inlined_call_operand.vmem [shape: f32[9,256], index: 0, kind: input, shape index: {}]   ;;  %s1275_s1 = inlined_call_operand.vmem [shape: f32[2,4,256], index: 1, kind: input, shape index: {}]   ;;  %s1276_s2 = inlined_call_operand.vmem [shape: f32[8,4], index: 2, kind: input, shape index: {}]   ;;  %s1277_s3 = inlined_call_operand.vmem [shape: f32[8,1], index: 3, kind: input, shape index: {}]   ;;  %s1278_s4 = inlined_call_operand.vmem [shape: f32[8,9], index: 4, kind: input, shape index: {}]   ;;  %s1279_s5 = inlined_call_operand.vmem [shape: f32[8,1], index: 5, kind: input, shape index: {}]   ;;  %s1280_s6 = inlined_call_operand.vmem [shape: f32[8,8], index: 6, kind: input, shape index: {}]   ;;  %s1281_s7 = inlined_call_operand.vmem [shape: f32[8,1], index: 7, kind: input, shape index: {}]   ;;  %s1282_s8 = inlined_call_operand.vmem [shape: f32[8,4], index: 8, kind: input, shape index: {}]   ;;  %s1283_s9 = inlined_call_operand.vmem [shape: f32[8,1], index: 9, kind: input, shape index: {}]   ;;  %s1284_s10 = inlined_call_operand.vmem [shape: f32[2,8,256], index: 10, kind: output, shape index: {}]  }
   0x1 LB: > { %s933_s14 = sadd.s32 4294967295, %s1011_s13   ;;  %p937_p0 = scmp.ge.s32.totalorder %s1011_s13, 1  ;;  %s1011_s13 = sphi %s1086_s13, %s20_s13  }
   0x2   : > { %p312_p1 = scmp.lt.s32.totalorder %s1011_s13, 3 }
   0x4   : > { %p313_p2 = pnand %p937_p0, %p312_p1 }
   0x5   : > { %p350_p3 = scmp.lt.s32.totalorder (!%p313_p2), %s933_s14, 1  ;;  %v1013_v0 = vmov (!%p313_p2), 0.0   ;;  %v1014_v1 = vmov (!%p313_p2), 0   ;;  %v362_v2 = vld [vmem:[%s1277_s3] sm:$0xff] (!%p313_p2)  ;;  %vm374_vm0 = vcmask (!%p313_p2), 1043456   ;;  %v1015_v5 = vmov (!%p313_p2), 4  }
   0x6   : > { %316 = sbr.rel (%p313_p2) target bundleno = 637 (0x27d), region = 60  ;;  %443 = vmatprep.mubr.f32.mxu0 (!%p313_p2), %v1013_v0  ;;  %992 = vset.pattern.permute.xlu0 (!%p313_p2), %v1014_v1  ;;  %v452_v3 = vld [vmem:[%s1278_s4] sm:$0xff] (!%p313_p2)  ;;  %v1016_v7 = vmov (!%p313_p2), 1   ;;  %vm370_vm1 = vcmask (!%p313_p2), 31744   ;;  %v1017_v9 = vmov (!%p313_p2), 3   ;;  %v1018_v10 = vmov (!%p313_p2), 2  }
   0x7   : > { %365 = vperm.xlu0 (!%p313_p2), %992, %v362_v2   ;;  %994 = vset.pattern.permute.xlu1 (!%p313_p2), %v1014_v1  ;;  %v361_v8 = vld [vmem:[%s1276_s2] sm:$0xff] (!%p313_p2)  ;;  %v1019_v11 = vmov (!%p313_p2), 5   ;;  %v1020_v12 = vmov (!%p313_p2), 6   ;;  %v1021_v13 = vmov (!%p313_p2), 7   ;;  %v1022_v14 = vmov (!%p313_p2), 8   ;;  %s1023_s25 = smov (!%p313_p2), 16  }
   0x8   : > { %484 = vperm.xlu1 (!%p313_p2), %994, %v452_v3   ;;  %786 = vmatprep.mubr.f32.mxu1 (!%p313_p2), %v1013_v0  ;;  %s1024_s26 = smov (!%p313_p2), 17   ;;  %s1025_s27 = smov (!%p313_p2), 15   ;;  %v701_v22 = vld [vmem:[%s1279_s5] sm:$0xff] (!%p313_p2)  ;;  %v464_v37 = vlaneseq (!%p313_p2)  ;;  %vm718_vm10 = vcmask (!%p313_p2), 64512  }
   0x9   : > { %s1026_s28 = smov (!%p313_p2), 1   ;;  %s1027_s29 = smov (!%p313_p2), 111   ;;  %v712_v23 = vld [vmem:[%s1281_s7] sm:$0xff] (!%p313_p2) }
   0xa   : > { %s1028_s30 = smov (!%p313_p2), 127   ;;  %s1029_s15 = smov (!%p313_p2), 113   ;;  %v794_v24 = vld [vmem:[%s1283_s9] sm:$0xff] (!%p313_p2)  ;;  %v472_v40 = vshrl.u32 (!%p313_p2), %v464_v37, 7  ;;  %v1167_v41 = vand.u32 (!%p313_p2), 127, %v464_v37 }
   0xb   : > { %993 = vset.pattern.permute.xlu0 (!%p313_p2), %v1015_v5  ;;  %s1030_s16 = smov (!%p313_p2), 112   ;;  %v469_v45 = vld [vmem:[%s1274_s0] ss:$8 sm:$0x3] (!%p313_p2) }
   0xc   : > { %455 = vperm.xlu0 (!%p313_p2), %993, %v452_v3   ;;  %995 = vset.pattern.permute.xlu1 (!%p313_p2), %v1016_v7  ;;  %v1171_v43 = vsub.s32 (!%p313_p2), 0, %v472_v40  ;;  %v1173_v44 = vsub.s32 (!%p313_p2), 1, %v472_v40  ;;  %vm466_vm2 = vcmp.lt.s32.totalorder (!%p313_p2), %v1167_v41, 17  ;;  %v945_v48 = vld [vmem:[%s1274_s0 + $0x1] ss:$8 sm:$0x3] (!%p313_p2) }
   0xd   : > { %s1286_s14 = smov (!%p350_p3, %s933_s14), 1  ;;  %514 = vperm.xlu1 %995, %v452_v3   ;;  %vm495_vm3 = vcmp.lt.s32.totalorder %v1167_v41, 16  ;;  %v946_v55 = vld [vmem:[%s1274_s0 + $0x2] ss:$8 sm:$0x3]  ;;  %vm525_vm4 = vcmp.lt.s32.totalorder %v1167_v41, 15 }
   0xe   : > { %s958_s19 = sshll.u32 %s1286_s14, 3  ;;  %v474_v49 = vrot.slane %v469_v45, %v1171_v43  ;;  %v478_v50 = vrot.slane %v469_v45, %v1173_v44  ;;  %v504_v53 = vrot.slane %v945_v48, %v1171_v43  ;;  %v508_v54 = vrot.slane %v945_v48, %v1173_v44  ;;  %v947_v61 = vld [vmem:[%s1274_s0 + $0x3] ss:$8 sm:$0x3]  ;;  %s959_s23 = sshll.u32 %s1286_s14, 4 }
   0xf   : > { %s354_s22 = scalar_lea.vmem %s1275_s1, %s958_s19  ;;  %v534_v62 = vrot.slane %v946_v55, %v1171_v43  ;;  %v538_v63 = vrot.slane %v946_v55, %v1173_v44  ;;  %vm555_vm5 = vcmp.lt.s32.totalorder %v1167_v41, 1  ;;  %vm585_vm6 = vcmp.lt.s32.totalorder %v1167_v41, 127 }
  0x10   : > { %v1110_v4 = vld [vmem:[%s354_s22] sm:$0xff]  ;;  %997 = vset.pattern.permute.xlu0 %v1017_v9  ;;  %vm615_vm7 = vcmp.lt.s32.totalorder %v1167_v41, 113  ;;  %vm645_vm8 = vcmp.lt.s32.totalorder %v1167_v41, 112  ;;  %vm675_vm9 = vcmp.lt.s32.totalorder %v1167_v41, 111 }
  0x11   : > { %v1114_v6 = vcombine.high %v1110_v4, %v1110_v4  ;;  %574 = vperm.xlu0 %997, %v452_v3   ;;  %996 = vset.pattern.permute.xlu1 %v1018_v10  ;;  %v564_v10 = vrot.slane %v947_v61, %v1171_v43  ;;  %v711_v41 = vld [vmem:[%s1280_s6] sm:$0xff] }
  0x12   : > { %544 = vperm.xlu1 %996, %v452_v3  }
  0x13   : > { %942 = vmatprep.subr.msk.mxu0 %vm374_vm0, %v1114_v6 }
  0x14   : > { %943 = vmatpush1.msk.msra.mxu0 %vm374_vm0, %v1110_v4 }
  0x15   : > { %944 = vmatmul.mubr.msk.f32.vlgmr.msra.gmra.mrb[0].mxu0 %vm370_vm1, %v361_v8  ;;  %998 = vset.pattern.permute.xlu0 %v1019_v11  ;;  %v948_v8 = vld [vmem:[%s1274_s0 + $0x5] ss:$8 sm:$0x3]  ;;  %v568_v11 = vrot.slane %v947_v61, %v1173_v44 }
  0x16   : > { %604 = vperm.xlu0 %998, %v452_v3   ;;  %1003 = vset.pattern.permute.xlu1 %v1014_v1 }
  0x1a   : > { %999 = vset.pattern.permute.xlu0 %v1020_v12 }
  0x1b   : > { %634 = vperm.xlu0 %999, %v452_v3  }
  0x1f   : > { %1000 = vset.pattern.permute.xlu0 %v1021_v13 }
  0x20   : > { %664 = vperm.xlu0 %1000, %v452_v3  }
  0x24   : > { %1001 = vset.pattern.permute.xlu0 %v1022_v14 }
  0x86   : > { %v366_v15 = vpop.permute.xlu0 %365 }
  0x87   : > { %v485_v25 = vpop.permute.xlu1 %484 }
  0x8b   : > { %v456_v27 = vpop.permute.xlu0 %455 }
  0x8c   : > { %v515_v26 = vpop.permute.xlu1 %514 }
  0x90   : > { %v1155_v28 = vpop.permute.xlu0 %574 }
  0x91   : > { %v1157_v29 = vpop.permute.xlu1 %544 }
  0x95   : > { %v1159_v30 = vpop.permute.xlu0 %604 }
  0x9a   : > { %v1161_v33 = vpop.permute.xlu0 %634 }
  0x9f   : > { %v1163_v35 = vpop.permute.xlu0 %664 }
  0xe8   : > { %v445_v16 = vpop.f32.mrb[0].mxu0 }
  0xe9   : > { %v446_v17 = vadd.f32 %v445_v16, %v366_v15  ;;  %v447_v18 = vpop.f32.mrb[1].mxu0 }
  0xea   : > { %v448_v20 = vadd.f32 %v447_v18, %v366_v15 }
  0xeb   : > { %v1125_v19 = vmax.f32 %v446_v17, 0.0 }
  0xec   : > { %v1129_v21 = vmax.f32 %v448_v20, 0.0  ;;  %v594_v20 = vrot.slane %v948_v8, %v1171_v43 }
  0xed   : > { %491 = vrot.lane.b32.xlu0 %v1125_v19, %s1023_s25  ;;  %460 = vrot.lane.b32.xlu1 %v1125_v19, %s1024_s26  ;;  %v458_v9 = vmul.f32 %v456_v27, %v1125_v19 }
  0xee   : > { %v459_v16 = vmul.f32 %v456_v27, %v1129_v21 }
  0xf1   : > { %462 = vrot.lane.b32.xlu0 %v1129_v21, %s1024_s26  ;;  %521 = vrot.lane.b32.xlu1 %v1125_v19, %s1025_s27  ;;  %s359_s26 = scalar_lea.vmem %s1284_s10, %s959_s23 }
  0xf5   : > { %694 = vperm.xlu0 %1001, %v452_v3   ;;  %551 = vrot.lane.b32.xlu1 %v1125_v19, %s1026_s28 }
  0xf9   : > { %671 = vrot.lane.b32.xlu0 %v1125_v19, %s1027_s29  ;;  %581 = vrot.lane.b32.xlu1 %v1125_v19, %s1028_s30 }
  0xfa   : > { %1002 = vset.pattern.permute.xlu0 %v1014_v1 }
  0xfd   : > { %611 = vrot.lane.b32.xlu1 %v1125_v19, %s1029_s15  ;;  %704 = vperm.xlu0 %1002, %v701_v22  }
 0x101   : > { %641 = vrot.lane.b32.xlu1 %v1125_v19, %s1030_s16  ;;  %v949_v19 = vld [vmem:[%s1274_s0 + $0x6] ss:$8 sm:$0x3] }
 0x102   : > { %v628_v40 = vrot.slane %v949_v19, %v1173_v44 }
 0x105   : > { %493 = vrot.lane.b32.xlu1 %v1129_v21, %s1023_s25 }
 0x109   : > { %523 = vrot.lane.b32.xlu1 %v1129_v21, %s1025_s27 }
 0x10d   : > { %553 = vrot.lane.b32.xlu1 %v1129_v21, %s1026_s28 }
 0x111   : > { %583 = vrot.lane.b32.xlu1 %v1129_v21, %s1028_s30 }
 0x115   : > { %613 = vrot.lane.b32.xlu1 %v1129_v21, %s1029_s15 }
 0x119   : > { %643 = vrot.lane.b32.xlu1 %v1129_v21, %s1030_s16 }
 0x11d   : > { %673 = vrot.lane.b32.xlu1 %v1129_v21, %s1027_s29 }
 0x121   : > { %715 = vperm.xlu1 %1003, %v712_v23  }
 0x125   : > { %797 = vperm.xlu1 %1003, %v794_v24   ;;  %v598_v24 = vrot.slane %v948_v8, %v1173_v44 }
 0x15f   : > { %v461_v31 = vpop.permute.xlu1 %460  ;;  %v492_v39 = vpop.permute.xlu0 %491 }
 0x163   : > { %v522_v32 = vpop.permute.xlu1 %521  ;;  %v463_v46 = vpop.permute.xlu0 %462 }
 0x164   : > { %v467_v51 = vsel %vm466_vm2, %v461_v31, %v463_v46  ;;  %v468_v52 = vsel %vm466_vm2, %v463_v46, %v461_v31  ;;  %v950_v46 = vld [vmem:[%s1274_s0 + $0x7] ss:$8 sm:$0x3] }
 0x165   : > { %v481_v59 = vmul.f32 %v474_v49, %v468_v52  ;;  %v482_v60 = vmul.f32 %v478_v50, %v467_v51 }
 0x167   : > { %v552_v34 = vpop.permute.xlu1 %551  ;;  %v487_v12 = vmul.f32 %v485_v25, %v481_v59  ;;  %v488_v13 = vmul.f32 %v485_v25, %v482_v60  ;;  %v658_v59 = vrot.slane %v950_v46, %v1173_v44 }
 0x169   : > { %v490_v37 = vadd.f32 %v488_v13, %v459_v16 }
 0x16b   : > { %v582_v36 = vpop.permute.xlu1 %581 }
 0x16f   : > { %v1165_v38 = vpop.permute.xlu1 %611 }
 0x173   : > { %v1169_v42 = vpop.permute.xlu1 %641 }
 0x174   : > { %v695_v55 = vpop.permute.xlu0 %694 }
 0x177   : > { %v494_v47 = vpop.permute.xlu1 %493 }
 0x178   : > { %v496_v57 = vsel %vm495_vm3, %v492_v39, %v494_v47  ;;  %v497_v58 = vsel %vm495_vm3, %v494_v47, %v492_v39  ;;  %v624_v39 = vrot.slane %v949_v19, %v1171_v43 }
 0x179   : > { %v511_v1 = vmul.f32 %v504_v53, %v497_v58  ;;  %v512_v2 = vmul.f32 %v508_v54, %v496_v57  ;;  %v951_v54 = vld [vmem:[%s1274_s0 + $0x10] ss:$8 sm:$0x3]  ;;  %v654_v58 = vrot.slane %v950_v46, %v1171_v43 }
 0x17b   : > { %v524_v56 = vpop.permute.xlu1 %523  ;;  %v517_v22 = vmul.f32 %v515_v26, %v511_v1  ;;  %v518_v23 = vmul.f32 %v515_v26, %v512_v2  ;;  %v688_v1 = vrot.slane %v951_v54, %v1173_v44 }
 0x17c   : > { %v526_v3 = vsel %vm525_vm4, %v522_v32, %v524_v56  ;;  %v527_v5 = vsel %vm525_vm4, %v524_v56, %v522_v32 }
 0x17d   : > { %v541_v17 = vmul.f32 %v534_v62, %v527_v5  ;;  %v542_v18 = vmul.f32 %v538_v63, %v526_v3  ;;  %v520_v48 = vadd.f32 %v518_v23, %v490_v37  ;;  %v684_v63 = vrot.slane %v951_v54, %v1171_v43 }
 0x17f   : > { %v554_v7 = vpop.permute.xlu1 %553  ;;  %v547_v26 = vmul.f32 %v1157_v29, %v541_v17  ;;  %v548_v45 = vmul.f32 %v1157_v29, %v542_v18 }
 0x180   : > { %v556_v14 = vsel %vm555_vm5, %v552_v34, %v554_v7  ;;  %v557_v15 = vsel %vm555_vm5, %v554_v7, %v552_v34  ;;  %v489_v34 = vadd.f32 %v487_v12, %v458_v9 }
 0x181   : > { %v571_v25 = vmul.f32 %v564_v10, %v557_v15  ;;  %v572_v32 = vmul.f32 %v568_v11, %v556_v14  ;;  %v550_v60 = vadd.f32 %v548_v45, %v520_v48  ;;  %v672_v11 = vpop.permute.xlu0 %671 }
 0x182   : > { %v519_v47 = vadd.f32 %v517_v22, %v489_v34  ;;  %v793_v34 = vld [vmem:[%s1282_s8] sm:$0xff] }
 0x183   : > { %v584_v31 = vpop.permute.xlu1 %583  ;;  %v577_v51 = vmul.f32 %v1155_v28, %v571_v25  ;;  %v578_v52 = vmul.f32 %v1155_v28, %v572_v32 }
 0x184   : > { %v586_v21 = vsel %vm585_vm6, %v582_v36, %v584_v31  ;;  %v587_v27 = vsel %vm585_vm6, %v584_v31, %v582_v36  ;;  %v549_v28 = vadd.f32 %v547_v26, %v519_v47 }
 0x185   : > { %v601_v49 = vmul.f32 %v594_v20, %v586_v21  ;;  %v602_v36 = vmul.f32 %v598_v24, %v587_v27  ;;  %v580_v3 = vadd.f32 %v578_v52, %v550_v60  ;;  %v705_v24 = vpop.permute.xlu0 %704 }
 0x186   : > { %v579_v2 = vadd.f32 %v577_v51, %v549_v28 }
 0x187   : > { %v614_v50 = vpop.permute.xlu1 %613  ;;  %v607_v61 = vmul.f32 %v1159_v30, %v601_v49  ;;  %v608_v62 = vmul.f32 %v1159_v30, %v602_v36 }
 0x188   : > { %v616_v53 = vsel %vm615_vm7, %v1165_v38, %v614_v50  ;;  %v617_v29 = vsel %vm615_vm7, %v614_v50, %v1165_v38 }
 0x189   : > { %v631_v56 = vmul.f32 %v624_v39, %v616_v53  ;;  %v632_v57 = vmul.f32 %v628_v40, %v617_v29  ;;  %v609_v43 = vadd.f32 %v607_v61, %v579_v2  ;;  %v610_v12 = vadd.f32 %v608_v62, %v580_v3 }
 0x18b   : > { %v644_v38 = vpop.permute.xlu1 %643  ;;  %v637_v8 = vmul.f32 %v1161_v33, %v631_v56  ;;  %v638_v9 = vmul.f32 %v1161_v33, %v632_v57 }
 0x18c   : > { %v646_v5 = vsel %vm645_vm8, %v1169_v42, %v644_v38  ;;  %v647_v7 = vsel %vm645_vm8, %v644_v38, %v1169_v42 }
 0x18d   : > { %v661_v30 = vmul.f32 %v654_v58, %v646_v5  ;;  %v662_v10 = vmul.f32 %v658_v59, %v647_v7  ;;  %v639_v18 = vadd.f32 %v637_v8, %v609_v43  ;;  %v640_v33 = vadd.f32 %v638_v9, %v610_v12 }
 0x18f   : > { %v667_v44 = vmul.f32 %v1163_v35, %v661_v30  ;;  %v668_v13 = vmul.f32 %v1163_v35, %v662_v10  ;;  %v674_v14 = vpop.permute.xlu1 %673 }
 0x190   : > { %v676_v15 = vsel %vm675_vm9, %v672_v11, %v674_v14  ;;  %v677_v42 = vsel %vm675_vm9, %v674_v14, %v672_v11 }
 0x191   : > { %v691_v16 = vmul.f32 %v684_v63, %v676_v15  ;;  %v692_v17 = vmul.f32 %v688_v1, %v677_v42  ;;  %v669_v20 = vadd.f32 %v667_v44, %v639_v18  ;;  %v670_v22 = vadd.f32 %v668_v13, %v640_v33 }
 0x193   : > { %v697_v19 = vmul.f32 %v695_v55, %v691_v16  ;;  %v698_v23 = vmul.f32 %v695_v55, %v692_v17 }
 0x195   : > { %v699_v31 = vadd.f32 %v697_v19, %v669_v20  ;;  %v700_v25 = vadd.f32 %v698_v23, %v670_v22 }
 0x197   : > { %v707_v32 = vadd.f32 %v705_v24, %v699_v31  ;;  %v708_v35 = vadd.f32 %v705_v24, %v700_v25 }
 0x199   : > { %v709_v21 = vmax.f32 %v707_v32, 0.0  ;;  %v710_v27 = vmax.f32 %v708_v35, 0.0 }
 0x19b   : > { %722 = vmatprep.subr.mxu1 %v710_v27 }
 0x19c   : > { %723 = vmatpush1.msra.mxu1 %v709_v21 }
 0x19d   : > { %952 = vmatmul.mubr.msk.f32.vlgmr.msra.gmra.mrb[0].mxu1 %vm718_vm10, %v711_v41  ;;  %953 = vmatprep.subr.msk.mxu1 %vm374_vm0, %v1114_v6 }
 0x19e   : > { %954 = vmatpush1.msk.msra.mxu1 %vm374_vm0, %v1110_v4  ;;  %867 = vmatprep.mubr.f32.mxu1 %v1013_v0 }
 0x1a0   : > { %v716_v37 = vpop.permute.xlu1 %715 }
 0x1a4   : > { %v798_v39 = vpop.permute.xlu1 %797 }
 0x1a5   : > { %955 = vmatmul.mubr.msk.f32.vlgmr.msra.gmra.mrb[0].mxu1 %vm370_vm1, %v793_v34  ;;  %v960_v40 = vadd.f32 %v798_v39, %v716_v37 }
 0x278   : > { %v869_v6 = vpop.f32.mrb[0].mxu1 }
 0x279   : > { %v961_v26 = vadd.f32 %v960_v40, %v869_v6  ;;  %v871_v45 = vpop.f32.mrb[1].mxu1 }
 0x27a   : > { %v963_v4 = vadd.f32 %v960_v40, %v871_v45 }
 0x27b   : > { %876 = vst [vmem:[%s359_s26] sm:$0xff] %v961_v26 }
 0x27c   : > { %877 = vst [vmem:[%s359_s26 + $0x8] sm:$0xff] %v963_v4 }
 0x27d PF: > { %s20_s13 = sadd.s32 1, %s1011_s13  }
 0x27e   : > { %p17_p4 = scmp.ge.s32.totalorder %s20_s13, 4  }
 0x280   :  { %19 = sbr.rel (!%p17_p4) target bundleno = 1 (0x1), region = 97 }

</bundles_post_ra>
